<compile_context>
chip_gen: v6e
topology: v6e:2x2x1
jax: 0.10.0
libtpu: 0.0.40
codegen_flags: <defaults>
</compile_context>

<pallas_src>
import functools

import jax
import jax.numpy as jnp
from jax import lax
from jax.experimental import pallas as pl
from jax.experimental.pallas import tpu as pltpu


def _round_up(v, m):
    return ((v + m - 1) // m) * m


def _cdiv(a, b):
    return (a + b - 1) // b


def proto_cls_kernel(x_ref, w_ref, o_ref, inv_ref, *, inv_temp):
    # x_ref:   (tm, in_dim)   raw input row tile (native dtype)
    # w_ref:   (in_dim, tn)   transposed prototype weights
    # o_ref:   (tm, tn)       logits tile
    # inv_ref: (tm, 1) f32    per-row (1/||x||_2) * (1/temp), hoisted over j
    @pl.when(pl.program_id(1) == 0)
    def _row_scale():
        xf = x_ref[...].astype(jnp.float32)
        sq = jnp.sum(xf * xf, axis=-1, keepdims=True)
        # F.normalize(..., eps=1e-12): x / max(||x||, 1e-12) == x * rsqrt(max(sq, 1e-24))
        inv_ref[...] = lax.rsqrt(jnp.maximum(sq, 1e-24)) * inv_temp

    logits = jnp.dot(x_ref[...], w_ref[...], preferred_element_type=jnp.float32)
    o_ref[...] = (logits * inv_ref[...]).astype(o_ref.dtype)


def _tpu_vmem_and_kind():
    kind = ""
    try:
        kind = jax.devices()[0].device_kind.lower()
    except Exception:
        pass
    cap = 0
    try:
        cap = int(pltpu.get_tpu_info().vmem_capacity_bytes)
    except Exception:
        cap = 0
    if cap <= 0:
        # Conservative fallbacks: 64 MiB per TC on v7x, 128 MiB on v5e/v6e.
        cap = (64 << 20) if "v7" in kind else (128 << 20)
    return cap, kind


def _plan_tiles(N, in_dim, out_dim, x_dtype, w_dtype, out_dtype):
    cap, kind = _tpu_vmem_and_kind()
    # ~100 MiB usable on v5e/v6e (128 MiB physical), ~51 MiB on v7x (64 MiB).
    budget = min(int(cap * 0.8), 100 << 20)

    x_item = jnp.dtype(x_dtype).itemsize
    w_item = jnp.dtype(w_dtype).itemsize
    out_item = jnp.dtype(out_dtype).itemsize
    sub = 8 if x_item >= 4 else (16 if x_item == 2 else 32)

    op128 = _round_up(out_dim, 128)                 # lane-dense output columns
    w_full_bytes = op128 * in_dim * w_item
    resident = w_full_bytes <= min(budget // 4, 16 << 20)

    if resident:
        tn = op128
        tm_target = 256
        restream_bytes = 0                          # weight DMA'd from HBM once
    else:
        tn = min(512, op128)
        # Per-generation HBM->MXU break-even (arithmetic intensity ~ tm).
        tm_target = 1024 if "v6" in kind else 512   # v7x (small VMEM) / v5e / unknown
        restream_bytes = op128 * in_dim * w_item    # full weight per row tile

    # Row-tile choice: minimize estimated HBM traffic (padding + weight re-streams).
    row_bytes = in_dim * x_item + op128 * out_item
    if N <= tm_target:
        cands = [_round_up(N, sub)]
    else:
        cands, t = [], tm_target
        while t >= max(sub, 64):
            cands.append(t)
            t //= 2

    def hbm_cost(t):
        tiles = _cdiv(N, t)
        return tiles * restream_bytes + tiles * t * row_bytes

    tm = min(cands, key=lambda t: (hbm_cost(t), -t))

    def footprint(tm_, tn_):
        return (2 * tm_ * in_dim * x_item           # x tile, double-buffered
                + 2 * in_dim * tn_ * w_item         # weight tile, double-buffered
                + 2 * tm_ * tn_ * out_item          # output tile, double-buffered
                + tm_ * 128 * 4                     # (tm,1) f32 scratch (lane-padded)
                + tm_ * in_dim * 4                  # in-kernel f32 temp (xf)
                + tm_ * tn_ * 4                     # in-kernel f32 accumulator
                + (2 << 20))                        # Mosaic internal headroom

    # Shrink tiles to fit the budget (never clamp the limit below the footprint).
    while footprint(tm, tn) > budget and tm > sub:
        tm = max(sub, _round_up(tm // 2, sub))
    while footprint(tm, tn) > budget and tn > 128:
        tn = max(128, _round_up(tn // 2, 128))

    vmem_limit = int(min(max(footprint(tm, tn), 32 << 20), int(cap * 0.9)))
    return tm, tn, vmem_limit


def proto_cls_forward(x, weight, temp=0.05, *, cast_to_bf16=False):
    """ProtoCLS forward.  x: (N, in_dim); weight: (out_dim, in_dim) (PyTorch nn.Linear layout)."""
    N, in_dim = x.shape
    out_dim, in_dim_w = weight.shape
    assert in_dim == in_dim_w

    out_dtype = x.dtype
    if cast_to_bf16 and x.dtype != jnp.bfloat16:
        x = x.astype(jnp.bfloat16)
        weight = weight.astype(jnp.bfloat16)

    tm, tn, vmem_limit = _plan_tiles(N, in_dim, out_dim, x.dtype, weight.dtype, out_dtype)

    Np = _round_up(N, tm)
    Op = _round_up(out_dim, tn)

    # Zero padding is safe: padded rows give logits == 0 (0 * finite inv == 0)
    # and padded prototype columns give logits == 0; both are sliced off below.
    if Np != N:
        x = jnp.pad(x, ((0, Np - N), (0, 0)))
    w_t = weight.T                                   # (in_dim, out_dim): canonical MXU layout
    if Op != out_dim:
        w_t = jnp.pad(w_t, ((0, 0), (0, Op - out_dim)))

    kernel = functools.partial(proto_cls_kernel, inv_temp=float(1.0 / temp))

    out = pl.pallas_call(
        kernel,
        out_shape=jax.ShapeDtypeStruct((Np, Op), out_dtype),
        grid_spec=pltpu.PrefetchScalarGridSpec(
            num_scalar_prefetch=0,
            grid=(Np // tm, Op // tn),
            in_specs=[
                pl.BlockSpec((tm, in_dim), lambda i, j: (i, 0)),
                # When tn == padded out_dim this block index is constant across
                # the whole grid, so the weight is DMA'd once and stays
                # VMEM-resident for all row tiles.
                pl.BlockSpec((in_dim, tn), lambda i, j: (0, j)),
            ],
            out_specs=pl.BlockSpec((tm, tn), lambda i, j: (i, j)),
            scratch_shapes=[pltpu.VMEM((tm, 1), jnp.float32)],
        ),
        compiler_params=pltpu.CompilerParams(
            # Rows shard across TensorCores (megacore); j is "arbitrary" so the
            # pl.when(j == 0) row-scale hoist runs first for each row tile.
            dimension_semantics=("parallel", "arbitrary"),
            vmem_limit_bytes=vmem_limit),
    )(x, w_t)

    if Np != N or Op != out_dim:
        out = out[:N, :out_dim]
    return out


def reference_forward(x, weight, temp=0.05):
    xf = x.astype(jnp.float32)
    norm = jnp.sqrt(jnp.sum(xf * xf, axis=1, keepdims=True))
    xn = xf / jnp.maximum(norm, 1e-12)
    return (xn @ weight.astype(jnp.float32).T) / temp


if __name__ == "__main__":
    key = jax.random.PRNGKey(0)
    k_x, k_w = jax.random.split(key)

    N, in_dim, out_dim = 8, 32, 16
    temp = 0.05

    x = jax.random.normal(k_x, (N, in_dim), dtype=jnp.float32)

    # fc weight (out_dim, in_dim), row L2-normalized as ProtoCLS.weight_norm().
    w = jax.random.normal(k_w, (out_dim, in_dim), dtype=jnp.float32)
    w = w / jnp.linalg.norm(w, axis=1, keepdims=True)

    ref = reference_forward(x, w, temp)

    # Default (dtype-preserving) path: tight tolerance vs. the f32 reference.
    out = jax.block_until_ready(proto_cls_forward(x, w, temp))
    assert out.shape == (N, out_dim)
    assert out.dtype == x.dtype
    assert jnp.allclose(out, ref, atol=1e-3, rtol=2e-3)

    # Fast-MXU path (bf16 operands, f32 accumulation): looser tolerance.
    out_bf16 = jax.block_until_ready(proto_cls_forward(x, w, temp, cast_to_bf16=True))
    assert out_bf16.shape == (N, out_dim)
    assert jnp.allclose(out_bf16, ref, atol=1e-1, rtol=5e-2)

    print("KERNEL_OK")
</pallas_src>

<mosaic_0001>
module attributes {stable_mosaic.version = 11 : i64} {
  func.func @proto_cls_kernel(%arg0: i32, %arg1: i32, %arg2: memref<8x32xf32, #tpu.memory_space<vmem>>, %arg3: memref<32x128xf32, #tpu.memory_space<vmem>>, %arg4: memref<8x128xf32, #tpu.memory_space<vmem>>, %arg5: memref<8x1xf32, #tpu.memory_space<vmem>>) attributes {dimension_semantics = [#tpu.dimension_semantics<parallel>, #tpu.dimension_semantics<arbitrary>], iteration_bounds = array<i64: 1, 1>, scalar_prefetch = 0 : i64, scratch_operands = 1 : i64, tpu.core_type = #tpu.core_type<tc>, window_params = [{transform_indices = @transform_0, window_bounds = array<i64: 8, 32>}, {transform_indices = @transform_1, window_bounds = array<i64: 32, 128>}, {transform_indices = @transform_2, window_bounds = array<i64: 8, 128>}]} {
    %c0_i32 = arith.constant 0 : i32
    %0 = arith.cmpi eq, %arg1, %c0_i32 : i32
    %1 = arith.extui %0 : i1 to i32
    %c0_i32_0 = arith.constant 0 : i32
    %2 = arith.cmpi ne, %1, %c0_i32_0 : i32
    scf.if %2 {
      %c0_8 = arith.constant 0 : index
      %c0_9 = arith.constant 0 : index
      %10 = vector.load %arg2[%c0_8, %c0_9] : memref<8x32xf32, #tpu.memory_space<vmem>>, vector<8x32xf32>
      %11 = arith.mulf %10, %10 : vector<8x32xf32>
      %cst_10 = arith.constant dense<0.000000e+00> : vector<8xf32>
      %12 = vector.multi_reduction <add>, %11, %cst_10 [1] : vector<8x32xf32> to vector<8xf32>
      %13 = vector.shape_cast %12 : vector<8xf32> to vector<8x1xf32>
      %cst_11 = arith.constant 1.000000e-24 : f32
      %14 = vector.broadcast %cst_11 : f32 to vector<8x1xf32>
      %15 = arith.maximumf %13, %14 : vector<8x1xf32>
      %16 = math.rsqrt %15 : vector<8x1xf32>
      %cst_12 = arith.constant 2.000000e+01 : f32
      %17 = vector.broadcast %cst_12 : f32 to vector<8x1xf32>
      %18 = arith.mulf %16, %17 : vector<8x1xf32>
      %c0_13 = arith.constant 0 : index
      %c0_14 = arith.constant 0 : index
      %19 = vector.load %arg5[%c0_13, %c0_14] : memref<8x1xf32, #tpu.memory_space<vmem>>, vector<8x1xf32>
      tpu.vector_store %arg5[%c0_13, %c0_14], %18 {strides = array<i32>} : memref<8x1xf32, #tpu.memory_space<vmem>>, vector<8x1xf32>,
    } else {
    }
    %c0 = arith.constant 0 : index
    %c0_1 = arith.constant 0 : index
    %3 = vector.load %arg2[%c0, %c0_1] : memref<8x32xf32, #tpu.memory_space<vmem>>, vector<8x32xf32>
    %c0_2 = arith.constant 0 : index
    %c0_3 = arith.constant 0 : index
    %4 = vector.load %arg3[%c0_2, %c0_3] : memref<32x128xf32, #tpu.memory_space<vmem>>, vector<32x128xf32>
    %cst = arith.constant dense<0.000000e+00> : vector<8x128xf32>
    %5 = tpu.matmul %3, %4, %cst {dimension_numbers = #tpu.dot_dimension_numbers<[1], [0], [0], [1], [0, 0, 1, 1], [], []>} : vector<8x32xf32>, vector<32x128xf32>, vector<8x128xf32> -> vector<8x128xf32>
    %c0_4 = arith.constant 0 : index
    %c0_5 = arith.constant 0 : index
    %6 = vector.load %arg5[%c0_4, %c0_5] : memref<8x1xf32, #tpu.memory_space<vmem>>, vector<8x1xf32>
    %7 = vector.broadcast %6 : vector<8x1xf32> to vector<8x128xf32>
    %8 = arith.mulf %5, %7 : vector<8x128xf32>
    %c0_6 = arith.constant 0 : index
    %c0_7 = arith.constant 0 : index
    %9 = vector.load %arg4[%c0_6, %c0_7] : memref<8x128xf32, #tpu.memory_space<vmem>>, vector<8x128xf32>
    tpu.vector_store %arg4[%c0_6, %c0_7], %8 {strides = array<i32>} : memref<8x128xf32, #tpu.memory_space<vmem>>, vector<8x128xf32>,
    return
  }
  func.func @transform_0(%arg0: i32, %arg1: i32) -> (i32, i32) {
    %c0_i32 = arith.constant 0 : i32
    %c0_i32_0 = arith.constant 0 : i32
    return %arg0, %c0_i32 : i32, i32
  }
  func.func @transform_1(%arg0: i32, %arg1: i32) -> (i32, i32) {
    %c0_i32 = arith.constant 0 : i32
    %c0_i32_0 = arith.constant 0 : i32
    return %c0_i32, %arg1 : i32, i32
  }
  func.func @transform_2(%arg0: i32, %arg1: i32) -> (i32, i32) {
    %c0_i32 = arith.constant 0 : i32
    return %arg0, %arg1 : i32, i32
  }
}

</mosaic_0001>

<bundles_post_ra>
// kernel: tpu_custom_call.1
= control target key start
LH: loop header
LB: loop body
LE: loop exit
PB: predicated region body
PF: predicated region fallthrough
CT: control target
= control target key end

     0   :  { %7 = vsyncpa [#allocation4], 0  ;;  %s282_s0 = inlined_call_operand.hbm [shape: f32[8,32], index: 0, kind: input, shape index: {}]   ;;  %s283_s1 = inlined_call_operand.hbm [shape: f32[32,128], index: 1, kind: input, shape index: {}]   ;;  %s284_s2 = inlined_call_operand.hbm [shape: f32[8,128], index: 2, kind: output, shape index: {}]  }
   0x1   :  { %8 = vsyncpa [#allocation7], 0 }
   0x2   :  { %9 = vsyncpa [#allocation5], 0  ;;  %s250_s9 = smov [#allocation3]   ;;  %s251_s11 = smov [#allocation6]  }
   0x3   :  { %s16_s10 = sshll.u32 %s250_s9, 4  ;;  %s25_s12 = sshll.u32 %s251_s11, 4  ;;  %s17_s10 = int_to_ptr.vmem [resolvable:$true] %s16_s10  ;;  %s26_s12 = int_to_ptr.vmem [resolvable:$true] %s25_s12 }
   0x4   :  { %s192_s13 = scalar_lea.vmem %s17_s10, 128  ;;  %p197_p1 = scmp.lt.s32.totalorder %s17_s10, %s17_s10 }
   0x5   :  { %p193_p0 = scmp.ne.s32.totalorder %s17_s10, %s192_s13  ;;  %p198_p2 = scmp.lt.s32.totalorder %s192_s13, %s192_s13 }
   0x7   :  { %p199_p3 = por %p198_p2, %p197_p1 }
   0x9   :  { %p200_p4 = pnand %p199_p3, %p193_p0 }
   0xb   :  { %203 = shalt.err (!%p200_p4)
}
   0xc   :  { %19 = dma.hbm_to_vmem [thread:$0]  %s282_s0, 128, %s17_s10, [#allocation4]  }
   0xd   :  { %s212_s16 = scalar_lea.vmem %s26_s12, 512  ;;  %p217_p6 = scmp.lt.s32.totalorder %s26_s12, %s26_s12 }
   0xe   :  { %p213_p5 = scmp.ne.s32.totalorder %s26_s12, %s212_s16  ;;  %p218_p7 = scmp.lt.s32.totalorder %s212_s16, %s212_s16 }
  0x10   :  { %p219_p8 = por %p218_p7, %p217_p6 }
  0x12   :  { %p220_p9 = pnand %p219_p8, %p213_p5 }
  0x14   :  { %223 = shalt.err (!%p220_p9)
}
  0x15   :  { %s252_s17 = smov 128   ;;  %s253_s18 = smov 8  }
  0x16   :  { %31 = dma.hbm_to_vmem [thread:$0]  %s283_s1, 512, %s26_s12, [#allocation7], %s252_s17, %s252_s17, %s253_s18  }
  0x17   :  { %244 = dma.done.wait [#allocation4], 128  }
  0x18   :  { %245 = vsyncadd [#allocation4], 4294967168 }
  0x19   :  { %246 = dma.done.wait [#allocation7], 512  }
  0x1a   :  { %247 = vsyncadd [#allocation7], 4294966784  ;;  %v254_v0 = vmov 0.0   ;;  %vm255_vm0 = vmmov 0   ;;  %v42_v1 = vld [vmem:[#allocation3] sm:$0xff]  ;;  %vm44_vm1 = vcmask 261120  }
  0x1b   :  { %162 = vmatprep.subr.mxu0 %v254_v0  ;;  %170 = vmatprep.mubr.msk.f32.mxu0 %vm255_vm0, %v254_v0  ;;  %v57_v2 = vld [vmem:[#allocation6 + $0x18] sm:$0xff]  ;;  %v56_v3 = vld [vmem:[#allocation6 + $0x10] sm:$0xff]  ;;  %v43_v4 = vmul.f32 %v42_v1, %v42_v1  ;;  %v55_v5 = vld [vmem:[#allocation6 + $0x8] sm:$0xff]  ;;  %v256_v8 = vmov 0   ;;  %vm51_vm2 = vcmask 7168   ;;  %s257_s0 = smov [#allocation8]  }
  0x1c   :  { %163 = vmatpush3.msra.mxu0 %v57_v2  ;;  %v54_v7 = vld [vmem:[#allocation6] sm:$0xff]  ;;  %181 = vset.pattern.permute.xlu0 %v256_v8  ;;  %s146_s1 = sshll.u32 %s257_s0, 4  ;;  %s147_s1 = int_to_ptr.vmem [resolvable:$true] %s146_s1 }
  0x1d   :  { %164 = vmatprep.subr.mxu0 %v254_v0  ;;  %v45_v6 = vsel %vm44_vm1, %v43_v4, 0.0  ;;  %s224_s21 = scalar_lea.vmem %s147_s1, 128  ;;  %p229_p11 = scmp.lt.s32.totalorder %s147_s1, %s147_s1 }
  0x1e   :  { %165 = vmatpush3.msra.mxu0 %v56_v3  ;;  %46 = vadd.xlane.f32.xlu0 %v45_v6  ;;  %p225_p10 = scmp.ne.s32.totalorder %s147_s1, %s224_s21  ;;  %p230_p12 = scmp.lt.s32.totalorder %s224_s21, %s224_s21 }
  0x1f   :  { %166 = vmatprep.subr.mxu0 %v254_v0 }
  0x20   :  { %167 = vmatpush3.msra.mxu0 %v55_v5  ;;  %p231_p13 = por %p230_p12, %p229_p11 }
  0x21   :  { %168 = vmatprep.subr.mxu0 %v254_v0 }
  0x22   :  { %169 = vmatpush3.msra.mxu0 %v54_v7  ;;  %p232_p0 = pnand %p231_p13, %p225_p10 }
  0x23   :  { %171 = vmatmul.mubr.msk.f32.vlgmr.msra.gmra.mxu0 %vm44_vm1, %v42_v1 }
  0xa7   :  { %v47_v9 = vpop.xlane.xlu0 %46 }
  0xa8   :  { %v48_v10 = vmax.f32 %v47_v9, 1e-24 }
  0xaa   :  { %182 = vrsqrt.f32 %v48_v10 }
  0xb7   :  { %v183_v11 = vpop.eup %182 }
  0xb8   :  { %v50_v12 = vmul.f32 20.0, %v183_v11 }
  0xba   :  { %52 = vst.msk [vmem:[#allocation2] sm:$0xff] %vm51_vm2, %v50_v12 }
  0xc1   :  { %v132_v13 = vld [vmem:[#allocation2] sm:$0xff] }
  0xc2   :  { %135 = vperm.xlu0 %181, %v132_v13  }
  0xe3   :  { %v128_v14 = vpop.f32.mrf.mxu0 }
  0xe5   :  { %v172_v15 = vpop.f32.mrf.mxu0 }
 0x13d   :  { %v136_v16 = vpop.permute.xlu0 %135 }
 0x13e   :  { %v138_v17 = vmul.f32 %v136_v16, %v128_v14 }
 0x140   :  { %139 = vst [vmem:[#allocation8] sm:$0xff] %v138_v17 }
 0x141   :  { %235 = shalt.err (!%p232_p0)
}
 0x142   :  { %149 = dma.vmem_to_hbm [thread:$0]  %s147_s1, 128, %s284_s2, [#allocation5]  }
 0x143   :  { %248 = dma.done.wait [#allocation5], 128  }
 0x144   :  { %249 = vsyncadd [#allocation5], 4294967168 }
 0x145   :  { %153 = vsyncpa [#allocation4], 1 }
 0x146   :  { %154 = vsyncpa [#allocation7], 1 }
 0x147   :  { %155 = vsyncpa [#allocation5], 1 }

</bundles_post_ra>
